<compile_context>
chip_gen: v7x
topology: tpu7x:2x2x1
jax: 0.10.0
libtpu: 0.0.40
codegen_flags: <defaults>
</compile_context>

<pallas_src>
import functools

import jax
import jax.numpy as jnp
from jax import lax
from jax.experimental import pallas as pl
from jax.experimental.pallas import tpu as pltpu


def _shift_flat(a, s):
    """a[:, p] -> a[:, p + s].  Wrapped tail values only land on flat
    positions that the pooling selection matrix never picks."""
    return jnp.concatenate([a[:, s:], a[:, :s]], axis=-1)


def _encoder_kernel(x_ref, w_ref, shift_ref, sel_ref, o_ref, *, W, L):
    """One batch image per grid step.

    x_ref:     (1, Cin, H*W)     VMEM  flattened input image (f32, lane-dense)
    w_ref:     (Cout, 9*Cin)     VMEM  BN-scale-folded conv weights (bf16),
                                        columns ordered (ky, kx, cin)
    shift_ref: (Cout, 1)         VMEM  fused conv-bias + BN shift (f32)
    sel_ref:   (L, Hp*Wp)        VMEM  0/1 matrix selecting flat position
                                        2*hp*W + 2*wp (pool window origins)
    o_ref:     (1, Cout, Hp*Wp)  VMEM  pooled output, single lane-dense store
    """
    x = x_ref[0]                                    # (Cin, H*W) f32

    # im2col: 9 contiguous lane slices of the flattened image, concatenated on
    # the sublane axis.  Built once per image (not per row).
    taps = []
    for ky in range(3):
        for kx in range(3):
            off = ky * W + kx
            taps.append(x[:, off:off + L])          # (Cin, L)
    col = jnp.concatenate(taps, axis=0)             # (9*Cin, L) f32

    # Convolution for every output row at once: one bf16 MXU matmul, f32 acc.
    y = jnp.dot(w_ref[...], col.astype(jnp.bfloat16),
                preferred_element_type=jnp.float32)     # (Cout, L) f32

    # fused conv-bias + BatchNorm(eval) shift, then ReLU (single broadcast).
    y = jnp.maximum(y + shift_ref[...], 0.0)

    # 2x2 / stride-2 max pool: neighbour maxima via two flat shifts
    # (W direction: +1, H direction: +W), then one 0/1 selection matmul that
    # gathers the stride-2 window origins lane-densely (exact in f32).
    z = jnp.maximum(y, _shift_flat(y, 1))
    z = jnp.maximum(z, _shift_flat(z, W))
    pooled = jnp.dot(z, sel_ref[...], preferred_element_type=jnp.float32)

    o_ref[0] = pooled.astype(o_ref.dtype)           # (Cout, Hp*Wp), one store


def encoder_block(x, conv_w, conv_b, gamma, beta, run_mean, run_var, eps=1e-5):
    """x: (N, Cin, H, W) float32 (NCHW).  conv_w: (Cout, Cin, 3, 3) torch layout."""
    N, Cin, H, W = x.shape
    Cout = conv_w.shape[0]
    Ho, Wo = H - 2, W - 2                  # valid 3x3 conv output size
    Hp, Wp = Ho // 2, Wo // 2              # floor-mode 2x2 pool output size
    # Flat conv-strip length: covers every flat position ever needed by the
    # pooling windows ((Ho-1)*W + Wo - 1 = Ho*W - 3) while keeping the largest
    # im2col tap offset (2*W + 2) inside the H*W flattened image.
    L = Ho * W - 2

    # --- one-time parameter prep (tiny tensors only; activations untouched) ---
    bn_scale = gamma * lax.rsqrt(run_var + eps)                     # (Cout,)
    w_scaled = conv_w * bn_scale[:, None, None, None]               # fold BN scale
    w9 = jnp.transpose(w_scaled, (0, 2, 3, 1)).reshape(Cout, 9 * Cin)
    w9 = w9.astype(jnp.bfloat16)                                    # cols: (ky, kx, cin)
    shift = ((conv_b - run_mean) * bn_scale + beta).reshape(Cout, 1)
    shift = shift.astype(jnp.float32)

    # 0/1 selection matrix: column (hp*Wp + wp) picks flat position 2*hp*W + 2*wp.
    p_idx = jnp.arange(L, dtype=jnp.int32)[:, None]
    o_idx = jnp.arange(Hp * Wp, dtype=jnp.int32)[None, :]
    sel = (p_idx == 2 * (o_idx // Wp) * W + 2 * (o_idx % Wp)).astype(jnp.float32)

    # Free contiguous fold (no data movement): lane-dense flattened image.
    x_flat = x.reshape(N, Cin, H * W)

    kernel = functools.partial(_encoder_kernel, W=W, L=L)

    flops = 2 * N * Cout * 9 * Cin * L + 2 * N * Cout * L * Hp * Wp
    bytes_accessed = (4 * x.size + 2 * w9.size + 4 * shift.size
                      + 4 * sel.size + 4 * N * Cout * Hp * Wp)

    # Per-step VMEM budget (double-buffered blocks + working set) with headroom.
    blk_bytes = (4 * Cin * H * W + 2 * Cout * 9 * Cin + 4 * Cout
                 + 4 * L * Hp * Wp + 4 * Cout * Hp * Wp)
    work_bytes = 4 * (9 * Cin + 3 * Cout) * L
    vmem_limit = int(min(64 * 2**20, max(32 * 2**20, 4 * (2 * blk_bytes + work_bytes))))

    out = pl.pallas_call(
        kernel,
        out_shape=jax.ShapeDtypeStruct((N, Cout, Hp * Wp), x.dtype),
        grid_spec=pltpu.PrefetchScalarGridSpec(
            num_scalar_prefetch=0,
            grid=(N,),
            in_specs=[
                pl.BlockSpec((1, Cin, H * W), lambda n: (n, 0, 0)),
                pl.BlockSpec((Cout, 9 * Cin), lambda n: (0, 0)),
                pl.BlockSpec((Cout, 1), lambda n: (0, 0)),
                pl.BlockSpec((L, Hp * Wp), lambda n: (0, 0)),
            ],
            out_specs=pl.BlockSpec((1, Cout, Hp * Wp), lambda n: (n, 0, 0)),
        ),
        compiler_params=pltpu.CompilerParams(
            dimension_semantics=("parallel",),
            vmem_limit_bytes=vmem_limit),
        cost_estimate=pl.CostEstimate(
            flops=flops, transcendentals=0, bytes_accessed=bytes_accessed),
    )(x_flat, w9, shift, sel)

    # Trailing-dim unfold back to NCHW (no data movement).
    return out.reshape(N, Cout, Hp, Wp)


def _reference(x_nchw, conv_w, conv_b, gamma, beta, run_mean, run_var,
               eps=1e-5):
    y = lax.conv_general_dilated(
        x_nchw, conv_w, window_strides=(1, 1), padding="VALID",
        dimension_numbers=("NCHW", "OIHW", "NCHW"))
    y = y + conv_b[None, :, None, None]
    y = (y - run_mean[None, :, None, None]) / jnp.sqrt(
        run_var[None, :, None, None] + eps)
    y = y * gamma[None, :, None, None] + beta[None, :, None, None]
    y = jnp.maximum(y, 0.0)
    y = lax.reduce_window(y, -jnp.inf, lax.max,
                          window_dimensions=(1, 1, 2, 2),
                          window_strides=(1, 1, 2, 2), padding="VALID")
    return y


if __name__ == "__main__":
    key = jax.random.PRNGKey(0)
    k = jax.random.split(key, 7)

    N, Cin, Cout, H, W = 2, 4, 8, 16, 16

    x = jax.random.normal(k[0], (N, Cin, H, W), jnp.float32)
    # Deterministic synthetic parameters (shapes from nn.Conv2d / nn.BatchNorm2d).
    fan_in = Cin * 3 * 3
    bound = 1.0 / jnp.sqrt(fan_in)
    conv_w = jax.random.uniform(k[1], (Cout, Cin, 3, 3), jnp.float32,
                                -bound, bound)
    conv_b = jax.random.uniform(k[2], (Cout,), jnp.float32, -bound, bound)
    gamma = 1.0 + 0.1 * jax.random.normal(k[3], (Cout,), jnp.float32)
    beta = 0.1 * jax.random.normal(k[4], (Cout,), jnp.float32)
    run_mean = 0.1 * jax.random.normal(k[5], (Cout,), jnp.float32)
    run_var = 1.0 + 0.1 * jnp.abs(jax.random.normal(k[6], (Cout,), jnp.float32))

    out = encoder_block(x, conv_w, conv_b, gamma, beta, run_mean, run_var)
    out = jax.block_until_ready(out)

    ref = _reference(x, conv_w, conv_b, gamma, beta, run_mean, run_var)
    assert out.shape == (N, Cout, (H - 2) // 2, (W - 2) // 2), out.shape
    err = float(jnp.max(jnp.abs(out - ref)))
    # bf16 conv-matmul inputs (f32 accumulation) -> relaxed tolerance.
    assert jnp.allclose(out, ref, atol=5e-2, rtol=5e-2), err

    print("KERNEL_OK")
</pallas_src>

<mosaic_0001>
module attributes {stable_mosaic.version = 11 : i64} {
  func.func @_encoder_kernel(%arg0: i32, %arg1: memref<1x4x256xf32, #tpu.memory_space<vmem>>, %arg2: memref<8x36xbf16, #tpu.memory_space<vmem>>, %arg3: memref<8x1xf32, #tpu.memory_space<vmem>>, %arg4: memref<222x49xf32, #tpu.memory_space<vmem>>, %arg5: memref<1x8x49xf32, #tpu.memory_space<vmem>>) attributes {dimension_semantics = [#tpu.dimension_semantics<parallel>], iteration_bounds = array<i64: 2>, scalar_prefetch = 0 : i64, scratch_operands = 0 : i64, tpu.core_type = #tpu.core_type<tc>, window_params = [{transform_indices = @transform_0, window_bounds = array<i64: 1, 4, 256>}, {pipeline_mode = #tpu.pipeline_mode<synchronous>, transform_indices = @transform_1, window_bounds = array<i64: 8, 36>}, {pipeline_mode = #tpu.pipeline_mode<synchronous>, transform_indices = @transform_2, window_bounds = array<i64: 8, 1>}, {pipeline_mode = #tpu.pipeline_mode<synchronous>, transform_indices = @transform_3, window_bounds = array<i64: 222, 49>}, {transform_indices = @transform_4, window_bounds = array<i64: 1, 8, 49>}]} {
    %c0 = arith.constant 0 : index
    %c0_0 = arith.constant 0 : index
    %c0_1 = arith.constant 0 : index
    %0 = vector.load %arg1[%c0, %c0_0, %c0_1] : memref<1x4x256xf32, #tpu.memory_space<vmem>>, vector<1x4x256xf32>
    %1 = vector.shape_cast %0 : vector<1x4x256xf32> to vector<4x256xf32>
    %2 = vector.extract_strided_slice %1 {offsets = [0, 0], sizes = [4, 222], strides = [1, 1]} : vector<4x256xf32> to vector<4x222xf32>
    %3 = vector.extract_strided_slice %1 {offsets = [0, 1], sizes = [4, 222], strides = [1, 1]} : vector<4x256xf32> to vector<4x222xf32>
    %4 = vector.extract_strided_slice %1 {offsets = [0, 2], sizes = [4, 222], strides = [1, 1]} : vector<4x256xf32> to vector<4x222xf32>
    %5 = vector.extract_strided_slice %1 {offsets = [0, 16], sizes = [4, 222], strides = [1, 1]} : vector<4x256xf32> to vector<4x222xf32>
    %6 = vector.extract_strided_slice %1 {offsets = [0, 17], sizes = [4, 222], strides = [1, 1]} : vector<4x256xf32> to vector<4x222xf32>
    %7 = vector.extract_strided_slice %1 {offsets = [0, 18], sizes = [4, 222], strides = [1, 1]} : vector<4x256xf32> to vector<4x222xf32>
    %8 = vector.extract_strided_slice %1 {offsets = [0, 32], sizes = [4, 222], strides = [1, 1]} : vector<4x256xf32> to vector<4x222xf32>
    %9 = vector.extract_strided_slice %1 {offsets = [0, 33], sizes = [4, 222], strides = [1, 1]} : vector<4x256xf32> to vector<4x222xf32>
    %10 = vector.extract_strided_slice %1 {offsets = [0, 34], sizes = [4, 222], strides = [1, 1]} : vector<4x256xf32> to vector<4x222xf32>
    %11 = tpu.concatenate %2, %3, %4, %5, %6, %7, %8, %9, %10 in 0 : vector<4x222xf32>, vector<4x222xf32>, vector<4x222xf32>, vector<4x222xf32>, vector<4x222xf32>, vector<4x222xf32>, vector<4x222xf32>, vector<4x222xf32>, vector<4x222xf32> -> vector<36x222xf32>
    %c0_2 = arith.constant 0 : index
    %c0_3 = arith.constant 0 : index
    %12 = vector.load %arg2[%c0_2, %c0_3] : memref<8x36xbf16, #tpu.memory_space<vmem>>, vector<8x36xbf16>
    %13 = arith.truncf %11 : vector<36x222xf32> to vector<36x222xbf16>
    %cst = arith.constant dense<0.000000e+00> : vector<8x222xf32>
    %14 = tpu.matmul %12, %13, %cst {dimension_numbers = #tpu.dot_dimension_numbers<[1], [0], [0], [1], [0, 0, 1, 1], [], []>} : vector<8x36xbf16>, vector<36x222xbf16>, vector<8x222xf32> -> vector<8x222xf32>
    %c0_4 = arith.constant 0 : index
    %c0_5 = arith.constant 0 : index
    %15 = vector.load %arg3[%c0_4, %c0_5] : memref<8x1xf32, #tpu.memory_space<vmem>>, vector<8x1xf32>
    %16 = vector.broadcast %15 : vector<8x1xf32> to vector<8x222xf32>
    %17 = arith.addf %14, %16 : vector<8x222xf32>
    %cst_6 = arith.constant 0.000000e+00 : f32
    %18 = vector.broadcast %cst_6 : f32 to vector<8x222xf32>
    %19 = arith.maximumf %17, %18 : vector<8x222xf32>
    %20 = vector.extract_strided_slice %19 {offsets = [0, 1], sizes = [8, 221], strides = [1, 1]} : vector<8x222xf32> to vector<8x221xf32>
    %21 = vector.extract_strided_slice %19 {offsets = [0, 0], sizes = [8, 1], strides = [1, 1]} : vector<8x222xf32> to vector<8x1xf32>
    %22 = tpu.concatenate %20, %21 in 1 : vector<8x221xf32>, vector<8x1xf32> -> vector<8x222xf32>
    %23 = arith.maximumf %19, %22 : vector<8x222xf32>
    %24 = vector.extract_strided_slice %23 {offsets = [0, 16], sizes = [8, 206], strides = [1, 1]} : vector<8x222xf32> to vector<8x206xf32>
    %25 = vector.extract_strided_slice %23 {offsets = [0, 0], sizes = [8, 16], strides = [1, 1]} : vector<8x222xf32> to vector<8x16xf32>
    %26 = tpu.concatenate %24, %25 in 1 : vector<8x206xf32>, vector<8x16xf32> -> vector<8x222xf32>
    %27 = arith.maximumf %23, %26 : vector<8x222xf32>
    %c0_7 = arith.constant 0 : index
    %c0_8 = arith.constant 0 : index
    %28 = vector.load %arg4[%c0_7, %c0_8] : memref<222x49xf32, #tpu.memory_space<vmem>>, vector<222x49xf32>
    %cst_9 = arith.constant dense<0.000000e+00> : vector<8x49xf32>
    %29 = tpu.matmul %27, %28, %cst_9 {dimension_numbers = #tpu.dot_dimension_numbers<[1], [0], [0], [1], [0, 0, 1, 1], [], []>} : vector<8x222xf32>, vector<222x49xf32>, vector<8x49xf32> -> vector<8x49xf32>
    %c0_10 = arith.constant 0 : index
    %c0_11 = arith.constant 0 : index
    %c0_12 = arith.constant 0 : index
    %30 = vector.load %arg5[%c0_10, %c0_11, %c0_12] : memref<1x8x49xf32, #tpu.memory_space<vmem>>, vector<1x8x49xf32>
    %31 = vector.shape_cast %30 : vector<1x8x49xf32> to vector<8x49xf32>
    %32 = vector.shape_cast %29 : vector<8x49xf32> to vector<1x8x49xf32>
    tpu.vector_store %arg5[%c0_10, %c0_11, %c0_12], %32 {strides = array<i32>} : memref<1x8x49xf32, #tpu.memory_space<vmem>>, vector<1x8x49xf32>,
    return
  }
  func.func @transform_0(%arg0: i32) -> (i32, i32, i32) {
    %c0_i32 = arith.constant 0 : i32
    %c0_i32_0 = arith.constant 0 : i32
    %c0_i32_1 = arith.constant 0 : i32
    return %arg0, %c0_i32, %c0_i32_0 : i32, i32, i32
  }
  func.func @transform_1(%arg0: i32) -> (i32, i32) {
    %c0_i32 = arith.constant 0 : i32
    %c0_i32_0 = arith.constant 0 : i32
    %c0_i32_1 = arith.constant 0 : i32
    return %c0_i32, %c0_i32_0 : i32, i32
  }
  func.func @transform_2(%arg0: i32) -> (i32, i32) {
    %c0_i32 = arith.constant 0 : i32
    %c0_i32_0 = arith.constant 0 : i32
    %c0_i32_1 = arith.constant 0 : i32
    return %c0_i32, %c0_i32_0 : i32, i32
  }
  func.func @transform_3(%arg0: i32) -> (i32, i32) {
    %c0_i32 = arith.constant 0 : i32
    %c0_i32_0 = arith.constant 0 : i32
    %c0_i32_1 = arith.constant 0 : i32
    return %c0_i32, %c0_i32_0 : i32, i32
  }
  func.func @transform_4(%arg0: i32) -> (i32, i32, i32) {
    %c0_i32 = arith.constant 0 : i32
    %c0_i32_0 = arith.constant 0 : i32
    %c0_i32_1 = arith.constant 0 : i32
    return %arg0, %c0_i32, %c0_i32_0 : i32, i32, i32
  }
}

</mosaic_0001>

<bundles_post_ra>
// kernel: tpu_custom_call.1
= control target key start
LH: loop header
LB: loop body
LE: loop exit
PB: predicated region body
PF: predicated region fallthrough
CT: control target
= control target key end

     0   :  { %9 = vsyncpa [#allocation3], 0  ;;  %s1050_s0 = inlined_call_operand.vmem [shape: f32[2,4,256], index: 0, kind: input, shape index: {}]   ;;  %s1051_s1 = inlined_call_operand.vmem [shape: bf16[8,36], index: 1, kind: input, shape index: {}]   ;;  %s1052_s2 = inlined_call_operand.vmem [shape: f32[8,1], index: 2, kind: input, shape index: {}]   ;;  %s1053_s3 = inlined_call_operand.vmem [shape: f32[222,49], index: 3, kind: input, shape index: {}]   ;;  %s1054_s4 = inlined_call_operand.hbm [shape: f32[2,8,49], index: 4, kind: output, shape index: {}]  }
   0x1   :  { %11 = vsyncpa [#allocation3 + $0x1], 0  ;;  %s811_s15 = smov 0   ;;  %s813_s16 = smov 0  }
   0x2   :  { %s815_s17 = smov 0   ;;  %s817_s18 = smov 0  }
   0x3 LB: > { %s832_s19 = sadd.s32 4294967295, %s770_s18   ;;  %s554_s20 = sadd.s32 4294967294, %s770_s18   ;;  %s770_s18 = sphi %s817_s18, %s1060_s18   ;;  %s766_s17 = sphi %s815_s17, %s1059_s17   ;;  %s762_s16 = sphi %s813_s16, %s1058_s16   ;;  %s758_s15 = sphi %s811_s15, %s1057_s15  }
   0x4   : > { %s836_s21 = sadd.s32 1, %s770_s18   ;;  %s113_s22 = sadd.s32 1, %s766_s17 }
   0x5   : > { %s110_s23 = ssub.s32 %s770_s18, %s836_s21  ;;  %p123_p0 = scmp.ne.s32.totalorder %s766_s17, %s762_s16 }
   0x6   : > { %p111_p1 = scmp.eq.s32.totalorder %s110_s23, 0  ;;  %p124_p2 = scmp.eq.s32.totalorder %s832_s19, 1 }
   0x7   : > { %p129_p3 = scmp.ne.s32.totalorder %s762_s16, %s758_s15  ;;  %p130_p4 = scmp.eq.s32.totalorder %s554_s20, 1 }
   0x8   : > { %s847_s24 = scalar_select %p111_p1, %s766_s17, %s113_s22  }
   0x9   : > { %p849_p5 = por %p124_p2, %p123_p0  ;;  %p853_p6 = por %p130_p4, %p129_p3 }
   0xa   : > { %p557_p7 = scmp.ge.s32.totalorder %s770_s18, 1  ;;  %p165_p8 = scmp.lt.s32.totalorder %s770_s18, 3 }
   0xc   : > { %p166_p9 = pnand %p557_p7, %p165_p8 }
   0xd   : > { %p191_p10 = scmp.lt.s32.totalorder (!%p166_p9), %s832_s19, 1  ;;  %s772_s6 = smov (!%p166_p9), 127   ;;  %v778_v5 = vmov (!%p166_p9), 0   ;;  %v282_v6 = vld [vmem:[%s1052_s2] sm:$0xff] (!%p166_p9)  ;;  %vm206_vm0 = vcmask (!%p166_p9), 1039360   ;;  %vm222_vm1 = vcmask (!%p166_p9), 916480  }
   0xe   : > { %169 = sbr.rel (%p166_p9) target bundleno = 856 (0x358), region = 36  ;;  %s773_s7 = smov (!%p166_p9), 112   ;;  %331 = vmatprep.mubr.bf16.mxu0 (!%p166_p9), %v778_v5  ;;  %705 = vset.pattern.permute.xlu0 (!%p166_p9), %v778_v5  ;;  %vm266_vm2 = vcmask (!%p166_p9), 1043456   ;;  %vm214_vm3 = vcmask (!%p166_p9), 1031168   ;;  %vm230_vm4 = vcmask (!%p166_p9), 908288   ;;  %vm238_vm5 = vcmask (!%p166_p9), 900096  }
   0xf   : > { %s774_s8 = smov (!%p166_p9), 126   ;;  %s775_s9 = smov (!%p166_p9), 111   ;;  %vm246_vm6 = vcmask (!%p166_p9), 785408   ;;  %vm254_vm7 = vcmask (!%p166_p9), 777216   ;;  %vm262_vm8 = vcmask (!%p166_p9), 769024   ;;  %vm292_vm9 = vcmask (!%p166_p9), 1041408  }
  0x10   : > { %s776_s10 = smov (!%p166_p9), 110   ;;  %s777_s11 = smov (!%p166_p9), 96   ;;  %v275_v54 = vld [vmem:[%s1051_s1] sm:$0xf] (!%p166_p9)  ;;  %vm288_vm10 = vcmask (!%p166_p9), 293888   ;;  %vm405_vm11 = vcmask (!%p166_p9), 1045504  }
  0x11   : > { %s779_s12 = smov (!%p166_p9), 95   ;;  %s780_s13 = smov (!%p166_p9), 94   ;;  %v374_v63 = vld [vmem:[%s1053_s3] sm:$0xff] (!%p166_p9)  ;;  %vm783_vm12 = vmmov (!%p166_p9), 1   ;;  %vm354_vm14 = vcmask (!%p166_p9), 760832   ;;  %vm370_vm15 = vcmask (!%p166_p9), 637952  }
  0x12   : > { %vm611_vm13 = vmpackc.low (!%p166_p9), %vm405_vm11, %vm783_vm12  ;;  %s566_s20 = sshll.u32 (!%p166_p9), %s832_s19, 7 }
  0x15   : > { %s192_s27 = scalar_select %p191_p10, %s832_s19, 1 }
  0x16   : > { %s785_s19 = smov [#allocation2]  }
  0x17   : > { %s569_s28 = sshll.u32 %s192_s27, 3 }
  0x18   : > { %s195_s5 = scalar_lea.vmem %s1050_s0, %s569_s28  ;;  %s1008_s28 = scalar_lea.hbm %s1054_s4, %s566_s20 }
  0x19   : > { %v197_v0 = vld [vmem:[%s195_s5] sm:$0xff] }
  0x1a   : > { %v201_v1 = vcombine.low %v197_v0, %v197_v0  ;;  %v199_v2 = vcombine.high %v197_v0, %v197_v0 }
  0x1c   : > { %v665_v3 = vpack.i.bf16 %v197_v0, %v201_v1  ;;  %v670_v4 = vpack.i.bf16 %v199_v2, %v197_v0  ;;  %v376_v1 = vld [vmem:[%s1053_s3 + $0x10] sm:$0xff] }
  0x1e   : > { %666 = vrot.lane.b32.xlu0 %v665_v3, %s772_s6  ;;  %676 = vrot.lane.b32.xlu1 %v665_v3, %s773_s7 }
  0x22   : > { %671 = vrot.lane.b32.xlu0 %v670_v4, %s774_s8  ;;  %681 = vrot.lane.b32.xlu1 %v670_v4, %s775_s9 }
  0x26   : > { %686 = vrot.lane.b32.xlu0 %v665_v3, %s776_s10  ;;  %691 = vrot.lane.b32.xlu1 %v670_v4, %s777_s11  ;;  %s782_s11 = smov 93  }
  0x2a   : > { %696 = vrot.lane.b32.xlu0 %v665_v3, %s779_s12  ;;  %701 = vrot.lane.b32.xlu1 %v670_v4, %s780_s13  ;;  %v377_v4 = vld [vmem:[%s1053_s3 + $0x18] sm:$0xff]  ;;  %s784_s12 = smov 78   ;;  %s188_s13 = sand.u32 1, %s762_s16  }
  0x2b   : > { %v574_v5 = vpack.c.bf16 %v377_v4, %v376_v1  ;;  %s558_s14 = sshll.u32 %s188_s13, 3  ;;  %s482_s29 = scalar_lea.sflag [#allocation3], %s188_s13 }
  0x2c   : > { %s190_s22 = scalar_lea.vmem [#allocation2], %s558_s14 }
  0x2d   : > { %s495_s23 = sshll.u32 %s190_s22, 4  ;;  %s1010_s23 = int_to_ptr.vmem [resolvable:$true] %s495_s23 }
  0x2e   : > { %285 = vperm.xlu0 %705, %v282_v6   ;;  %s708_s30 = scalar_lea.vmem %s1010_s23, 128 }
  0x2f   : > { %p709_p11 = scmp.ne.s32.totalorder %s1010_s23, %s708_s30 }
  0x31   : > { %p710_p12 = pnand %p709_p11, %p849_p5 }
  0x33   : > { %p711_p13 = pneg %p710_p12 }
  0x90   : > { %v667_v7 = vpop.permute.xlu0 %666  ;;  %v677_v8 = vpop.permute.xlu1 %676 }
  0x91   : > { %v669_v9 = vunpack.i.h.bf16 %v667_v7  ;;  %v668_v10 = vunpack.i.l.bf16 %v667_v7  ;;  %v679_v11 = vunpack.i.h.bf16 %v677_v8  ;;  %v678_v12 = vunpack.i.l.bf16 %v677_v8  ;;  %v378_v7 = vld [vmem:[%s1053_s3 + $0x20] sm:$0xff]  ;;  %v379_v8 = vld [vmem:[%s1053_s3 + $0x28] sm:$0xff] }
  0x93   : > { %v207_v15 = vsel %vm206_vm0, %v668_v10, %v669_v9  ;;  %v223_v18 = vsel %vm222_vm1, %v678_v12, %v679_v11  ;;  %v268_v19 = vsel %vm266_vm2, %v199_v2, %v669_v9  ;;  %v781_v2 = vmov 0.0|0.0   ;;  %v380_v10 = vld [vmem:[%s1053_s3 + $0x30] sm:$0xff] }
  0x94   : > { %v672_v13 = vpop.permute.xlu0 %671  ;;  %v682_v14 = vpop.permute.xlu1 %681  ;;  %v267_v22 = vsel %vm266_vm2, %v197_v0, %v207_v15  ;;  %v375_v0 = vld [vmem:[%s1053_s3 + $0x8] sm:$0xff]  ;;  %570 = vmatprep.subr.bf16.mxu1 %v781_v2  ;;  %v577_v9 = vpack.c.bf16 %v379_v8, %v378_v7 }
  0x95   : > { %v674_v16 = vunpack.i.h.bf16 %v672_v13  ;;  %v673_v17 = vunpack.i.l.bf16 %v672_v13  ;;  %v684_v23 = vunpack.i.h.bf16 %v682_v14  ;;  %v683_v24 = vunpack.i.l.bf16 %v682_v14  ;;  %v382_v13 = vld [vmem:[%s1053_s3 + $0x40] sm:$0xff]  ;;  %v383_v14 = vld [vmem:[%s1053_s3 + $0x48] sm:$0xff] }
  0x96   : > { %v571_v3 = vpack.c.bf16 %v375_v0, %v374_v63  ;;  %v583_v15 = vpack.c.bf16 %v383_v14, %v382_v13 }
  0x97   : > { %v270_v20 = vsel %vm266_vm2, %v674_v16, %v679_v11  ;;  %v215_v21 = vsel %vm214_vm3, %v673_v17, %v674_v16  ;;  %v231_v34 = vsel %vm230_vm4, %v683_v24, %v684_v23  ;;  %v381_v11 = vld [vmem:[%s1053_s3 + $0x38] sm:$0xff]  ;;  %v384_v16 = vld [vmem:[%s1053_s3 + $0x50] sm:$0xff] }
  0x98   : > { %v687_v25 = vpop.permute.xlu0 %686  ;;  %v277_v26 = vpack.c.bf16 %v270_v20, %v268_v19  ;;  %v269_v27 = vsel %vm266_vm2, %v215_v21, %v223_v18  ;;  %v692_v28 = vpop.permute.xlu1 %691  ;;  %572 = vmatpush1.bf16.msra.mxu1 %v571_v3  ;;  %v580_v12 = vpack.c.bf16 %v381_v11, %v380_v10  ;;  %v385_v17 = vld [vmem:[%s1053_s3 + $0x58] sm:$0xff]  ;;  %v386_v19 = vld [vmem:[%s1053_s3 + $0x60] sm:$0xff]  ;;  %v387_v20 = vld [vmem:[%s1053_s3 + $0x68] sm:$0xff] }
  0x99   : > { %v689_v29 = vunpack.i.h.bf16 %v687_v25  ;;  %v688_v30 = vunpack.i.l.bf16 %v687_v25  ;;  %v276_v31 = vpack.c.bf16 %v269_v27, %v267_v22  ;;  %v694_v32 = vunpack.i.h.bf16 %v692_v28  ;;  %573 = vmatprep.subr.bf16.mxu1 %v781_v2  ;;  %v388_v22 = vld [vmem:[%s1053_s3 + $0x70] sm:$0xff]  ;;  %v390_v25 = vld [vmem:[%s1053_s3 + $0x80] sm:$0xff] }
  0x9a   : > { %299 = vmatprep.subr.bf16.mxu0 %v277_v26  ;;  %v693_v33 = vunpack.i.l.bf16 %v692_v28  ;;  %v586_v18 = vpack.c.bf16 %v385_v17, %v384_v16  ;;  %v589_v21 = vpack.c.bf16 %v387_v20, %v386_v19  ;;  %v391_v26 = vld [vmem:[%s1053_s3 + $0x88] sm:$0xff]  ;;  %v392_v28 = vld [vmem:[%s1053_s3 + $0x90] sm:$0xff] }
  0x9b   : > { %300 = vmatpush1.bf16.msra.mxu0 %v276_v31  ;;  %v239_v35 = vsel %vm238_vm5, %v688_v30, %v689_v29  ;;  %v272_v43 = vsel %vm266_vm2, %v684_v23, %v689_v29  ;;  %v389_v23 = vld [vmem:[%s1053_s3 + $0x78] sm:$0xff]  ;;  %v595_v27 = vpack.c.bf16 %v391_v26, %v390_v25  ;;  %v394_v31 = vld [vmem:[%s1053_s3 + $0xa0] sm:$0xff] }
  0x9c   : > { %v247_v36 = vsel %vm246_vm6, %v693_v33, %v694_v32  ;;  %v697_v37 = vpop.permute.xlu0 %696  ;;  %v702_v38 = vpop.permute.xlu1 %701  ;;  %v271_v46 = vsel %vm266_vm2, %v231_v34, %v239_v35  ;;  %575 = vmatpush1.bf16.msra.mxu1 %v574_v5  ;;  %v592_v24 = vpack.c.bf16 %v389_v23, %v388_v22  ;;  %v393_v29 = vld [vmem:[%s1053_s3 + $0x98] sm:$0xff]  ;;  %v396_v34 = vld [vmem:[%s1053_s3 + $0xb0] sm:$0xff] }
  0x9d   : > { %v699_v39 = vunpack.i.h.bf16 %v697_v37  ;;  %v698_v40 = vunpack.i.l.bf16 %v697_v37  ;;  %v704_v41 = vunpack.i.h.bf16 %v702_v38  ;;  %v703_v42 = vunpack.i.l.bf16 %v702_v38  ;;  %576 = vmatprep.subr.bf16.mxu1 %v781_v2  ;;  %v397_v35 = vld [vmem:[%s1053_s3 + $0xb8] sm:$0xff]  ;;  %v398_v37 = vld [vmem:[%s1053_s3 + $0xc0] sm:$0xff]  ;;  %v399_v38 = vld [vmem:[%s1053_s3 + $0xc8] sm:$0xff] }
  0x9e   : > { %v598_v30 = vpack.c.bf16 %v393_v29, %v392_v28 }
  0x9f   : > { %v255_v44 = vsel %vm254_vm7, %v698_v40, %v699_v39  ;;  %v274_v45 = vsel %vm266_vm2, %v694_v32, %v699_v39  ;;  %v263_v47 = vsel %vm262_vm8, %v703_v42, %v704_v41  ;;  %v281_v48 = vpack.c.bf16 %v704_v41, %v704_v41  ;;  %v395_v32 = vld [vmem:[%s1053_s3 + $0xa8] sm:$0xff]  ;;  %v400_v40 = vld [vmem:[%s1053_s3 + $0xd0] sm:$0xff]  ;;  %v401_v41 = vld [vmem:[%s1053_s3 + $0xd8] sm:$0x3f] }
  0xa0   : > { %v279_v49 = vpack.c.bf16 %v274_v45, %v272_v43  ;;  %v273_v50 = vsel %vm266_vm2, %v247_v36, %v255_v44  ;;  %v280_v51 = vpack.c.bf16 %v263_v47, %v263_v47  ;;  %578 = vmatpush1.bf16.msra.mxu1 %v577_v9  ;;  %v601_v33 = vpack.c.bf16 %v395_v32, %v394_v31 }
  0xa1   : > { %v278_v52 = vpack.c.bf16 %v273_v50, %v271_v46  ;;  %579 = vmatprep.subr.bf16.mxu1 %v781_v2  ;;  %v604_v36 = vpack.c.bf16 %v397_v35, %v396_v34  ;;  %v607_v39 = vpack.c.bf16 %v399_v38, %v398_v37  ;;  %v610_v42 = vpack.c.bf16 %v401_v41, %v400_v40 }
  0xa2   : > { %301 = vmatprep.subr.bf16.mxu0 %v279_v49  ;;  %v294_v53 = vsel %vm292_vm9, %v280_v51, 0 }
  0xa3   : > { %302 = vmatpush1.bf16.msra.mxu0 %v278_v52 }
  0xa4   : > { %561 = vmatprep.subr.msk.bf16.mxu0 %vm292_vm9, %v281_v48  ;;  %581 = vmatpush1.bf16.msra.mxu1 %v580_v12 }
  0xa5   : > { %582 = vmatprep.subr.bf16.mxu1 %v781_v2 }
  0xa7   : > { %304 = vmatpush1.bf16.msra.mxu0 %v294_v53 }
  0xa8   : > { %584 = vmatpush1.bf16.msra.mxu1 %v583_v15 }
  0xa9   : > { %585 = vmatprep.subr.bf16.mxu1 %v781_v2 }
  0xaa   : > { %562 = vmatmul.mubr.msk.bf16.vlgmr.msra.gmra.mrb[0].mxu0 %vm288_vm10, %v275_v54 }
  0xac   : > { %587 = vmatpush1.bf16.msra.mxu1 %v586_v18 }
  0xad   : > { %v286_v55 = vpop.permute.xlu0 %285  ;;  %588 = vmatprep.subr.bf16.mxu1 %v781_v2 }
  0xb0   : > { %590 = vmatpush1.bf16.msra.mxu1 %v589_v21 }
  0xb1   : > { %591 = vmatprep.subr.bf16.mxu1 %v781_v2 }
  0xb4   : > { %593 = vmatpush1.bf16.msra.mxu1 %v592_v24 }
  0xb5   : > { %594 = vmatprep.subr.bf16.mxu1 %v781_v2 }
  0xb8   : > { %596 = vmatpush1.bf16.msra.mxu1 %v595_v27 }
  0xb9   : > { %597 = vmatprep.subr.bf16.mxu1 %v781_v2 }
  0xbc   : > { %599 = vmatpush1.bf16.msra.mxu1 %v598_v30 }
  0xbd   : > { %600 = vmatprep.subr.bf16.mxu1 %v781_v2 }
  0xc0   : > { %602 = vmatpush1.bf16.msra.mxu1 %v601_v33 }
  0xc1   : > { %603 = vmatprep.subr.bf16.mxu1 %v781_v2 }
  0xc4   : > { %605 = vmatpush1.bf16.msra.mxu1 %v604_v36 }
  0xc5   : > { %606 = vmatprep.subr.bf16.mxu1 %v781_v2 }
  0xc8   : > { %608 = vmatpush1.bf16.msra.mxu1 %v607_v39 }
  0xc9   : > { %609 = vmatprep.subr.bf16.mxu1 %v781_v2 }
  0xcc   : > { %612 = vmatpush1.bf16.msk.msra.mxu1 %vm611_vm13, %v610_v42 }
 0x17d   : > { %v333_v56 = vpop.f32.mrb[0].mxu0 }
 0x17e   : > { %v334_v57 = vadd.f32 %v333_v56, %v286_v55  ;;  %v335_v58 = vpop.f32.mrb[1].mxu0 }
 0x17f   : > { %v337_v59 = vpop.f32.mrb[2].mxu0  ;;  %v888_v61 = vadd.f32 %v335_v58, %v286_v55 }
 0x180   : > { %v886_v60 = vmax.f32 %v334_v57, 0.0  ;;  %v338_v62 = vpop.f32.mrb[3].mxu0 }
 0x181   : > { %v341_v6 = vmax.f32 %v888_v61, 0.0 }
 0x182   : > { %351 = vrot.lane.b32.xlu0 %v886_v60, %s782_s11  ;;  %344 = vrot.lane.b32.xlu1 %v886_v60, %s772_s6 }
 0x186   : > { %346 = vrot.lane.b32.xlu1 %v341_v6, %s772_s6  ;;  %s712_s6 = sshll.u32 %s785_s19, 4  ;;  %s713_s6 = int_to_ptr.vmem [resolvable:$false] %s712_s6 }
 0x187   : > { %s714_s5 = scalar_lea.vmem %s713_s6, 256  ;;  %p715_p0 = scmp.lt.s32.totalorder %s1010_s23, %s713_s6 }
 0x188   : > { %p716_p1 = scmp.lt.s32.totalorder %s714_s5, %s708_s30 }
 0x18a   : > { %p717_p2 = por %p716_p1, %p715_p0 }
 0x18c   : > { %p718_p3 = pnand %p717_p2, %p711_p13 }
 0x1f4   : > { %v345_v43 = vpop.permute.xlu1 %344  ;;  %v352_v44 = vpop.permute.xlu0 %351 }
 0x1f8   : > { %v347_v45 = vpop.permute.xlu1 %346 }
 0x1f9   : > { %v348_v46 = vsel %vm206_vm0, %v345_v43, %v347_v45  ;;  %v355_v47 = vsel %vm354_vm14, %v347_v45, %v352_v44  ;;  %vm479_vm0 = vcmask 400384  }
 0x1fa   : > { %v356_v48 = vmax.f32 %v886_v60, %v348_v46  ;;  %v357_v49 = vmax.f32 %v341_v6, %v355_v47 }
 0x1fc   : > { %362 = vrot.lane.b32.xlu1 %v357_v49, %s773_s7  ;;  %367 = vrot.lane.b32.xlu0 %v356_v48, %s784_s12 }
 0x200   : > { %360 = vrot.lane.b32.xlu1 %v356_v48, %s773_s7 }
 0x26e   : > { %v363_v50 = vpop.permute.xlu1 %362  ;;  %v368_v51 = vpop.permute.xlu0 %367 }
 0x26f   : > { %v371_v52 = vsel %vm370_vm15, %v363_v50, %v368_v51 }
 0x270   : > { %v373_v53 = vmax.f32 %v357_v49, %v371_v52 }
 0x272   : > { %v361_v54 = vpop.permute.xlu1 %360  ;;  %564 = vmatprep.mubr.msk.f32.mxu1 %vm262_vm8, %v373_v53 }
 0x273   : > { %v364_v55 = vsel %vm222_vm1, %v361_v54, %v363_v50 }
 0x274   : > { %v372_v56 = vmax.f32 %v356_v48, %v364_v55 }
 0x276   : > { %474 = vmatmul.mubr.f32.vlgmr.msra.gmra.mrb[0].mxu1 %v372_v56 }
 0x349   : > { %v475_v57 = vpop.f32.mrb[0].mxu1 }
 0x34a   : > { %480 = vst.msk [vmem:[%s190_s22] sm:$0xff] %vm479_vm0, %v475_v57  ;;  %v477_v58 = vpop.f32.mrb[1].mxu1 }
 0x34b   : > { %721 = shalt.err (!%p718_p3)
}
 0x34c   : > { %s722_s8 = scalar_lea.hbm %s1008_s28, 128  ;;  %s726_s11 = scalar_lea.hbm %s1054_s4, 256 }
 0x34d   : > { %p723_p4 = scmp.ne.s32.totalorder %s1008_s28, %s722_s8  ;;  %p727_p9 = scmp.lt.u32.totalorder %s1008_s28, %s1054_s4 }
 0x34e   : > { %p728_p10 = scmp.lt.u32.totalorder %s726_s11, %s722_s8  ;;  %p730_p12 = scmp.lt.u32.totalorder %s722_s8, %s1008_s28 }
 0x34f   : > { %p724_p7 = pnand %p723_p4, %p849_p5 }
 0x350   : > { %p729_p11 = por %p728_p10, %p727_p9 }
 0x351   : > { %p725_p8 = pneg %p724_p7 }
 0x352   : > { %p731_p13 = por %p730_p12, %p729_p11 }
 0x354   : > { %p732_p0 = pnand %p731_p13, %p725_p8 }
 0x356   : > { %735 = shalt.err (!%p732_p0)
}
 0x357   : > { %613 = dma.vmem_to_hbm [thread:$0]  (%p849_p5), %s1010_s23, 128, %s1008_s28, %s482_s29  }
 0x358 PF: > { %p619_p1 = scmp.ge.s32.totalorder %s770_s18, 2  ;;  %s507_s14 = sand.u32 1, %s758_s15  }
 0x359   : > { %s508_s20 = scalar_lea.sflag [#allocation3], %s507_s14 }
 0x35a   : > { %p616_p2 = pnand %p619_p1, %p853_p6 }
 0x35c   : > { %753 = dma.done.wait (!%p616_p2), %s508_s20, 128  }
 0x35d   : > { %755 = vsyncadd (!%p616_p2), %s508_s20, 4294967168  ;;  %p14_p3 = scmp.ge.s32.totalorder %s836_s21, 4   ;;  %s1057_s15 = smov %s762_s16 }
 0x35e   : > { %s1058_s16 = smov %s766_s17  ;;  %s1059_s17 = smov %s847_s24 }
 0x35f   : > { %s1060_s18 = smov %s836_s21  ;;  %16 = sbr.rel (!%p14_p3) target bundleno = 3 (0x3), region = 71 }
 0x366   :  { %513 = vsyncpa [#allocation3], 1 }
 0x367   :  { %515 = vsyncpa [#allocation3 + $0x1], 1 }

</bundles_post_ra>
